<compile_context>
chip_gen: v5e
topology: v5e:2x2
jax: 0.10.0
libtpu: 0.0.40
codegen_flags: <defaults>
</compile_context>

<pallas_src>
import jax
import jax.numpy as jnp
from jax.experimental import pallas as pl
from jax.experimental.pallas import tpu as pltpu


def _hbm_copy_kernel(x_ref, o_ref):
    # Whole-slab HBM->HBM DMA: no VMEM bounce, no vector loads/stores,
    # no grid, no per-tile overhead.
    def body(sem):
        cp = pltpu.make_async_copy(x_ref, o_ref, sem)
        cp.start()
        cp.wait()

    pl.run_scoped(body, pltpu.SemaphoreType.DMA)


def _flatten_dims(shape):
    n = shape[0]
    d = 1
    for s in shape[1:]:
        d *= s
    return n, d


def flatten(feat: jax.Array, *, force_kernel: bool = False) -> jax.Array:
    """Pallas implementation of Flatten.forward: feat.view(feat.size(0), -1).

    Default: metadata-only reshape (free; identical element order to torch
    .view since both are row-major / C-contiguous).  Set force_kernel=True
    only if an explicit Pallas materialization / fusion boundary is required;
    that path is a single HBM->HBM DMA of the already-flattened slab.
    """
    n, d = _flatten_dims(feat.shape)
    x2d = feat.reshape(n, d)  # free, metadata-only; matches torch .view order

    if not force_kernel:
        return x2d

    itemsize = jnp.dtype(feat.dtype).itemsize
    return pl.pallas_call(
        _hbm_copy_kernel,
        out_shape=jax.ShapeDtypeStruct((n, d), feat.dtype),
        in_specs=[pl.BlockSpec(memory_space=pl.ANY)],
        out_specs=pl.BlockSpec(memory_space=pl.ANY),
        cost_estimate=pl.CostEstimate(
            flops=0,
            transcendentals=0,
            bytes_accessed=2 * n * d * itemsize,
        ),
    )(x2d)


if __name__ == "__main__":
    key = jax.random.PRNGKey(0)
    # Small NCHW input consistent with a conv feature map: (2, 4, 16, 16)
    x = jax.random.normal(key, (2, 4, 16, 16), dtype=jnp.float32)

    # Reference: plain reshape (same semantics as torch .view on contiguous).
    ref = x.reshape(x.shape[0], -1)

    # Default (recommended) path: metadata-only flatten, zero HBM traffic.
    out = flatten(x)
    jax.block_until_ready(out)
    assert out.shape == (2, 4 * 16 * 16), out.shape
    assert out.dtype == x.dtype
    assert jnp.array_equal(out, ref), "mismatch vs reference (metadata path)"

    # Opt-in explicit-kernel path: single whole-slab HBM->HBM DMA.
    out_k = flatten(x, force_kernel=True)
    jax.block_until_ready(out_k)
    assert out_k.shape == (2, 4 * 16 * 16), out_k.shape
    assert out_k.dtype == x.dtype
    assert jnp.array_equal(out_k, ref), "mismatch vs reference (kernel path)"

    print("KERNEL_OK")
</pallas_src>

<mosaic_0001>
module attributes {stable_mosaic.version = 11 : i64} {
  func.func @_hbm_copy_kernel(%arg0: memref<2x1024xf32, #tpu.memory_space<any>>, %arg1: memref<2x1024xf32, #tpu.memory_space<any>>) attributes {dimension_semantics = [], scalar_prefetch = 0 : i64, scratch_operands = 0 : i64, tpu.core_type = #tpu.core_type<tc>} {
    "tpu.region"() ({
      %0 = tpu.sem_alloc : memref<!tpu.dma_semaphore, #tpu.memory_space<semaphore_mem>>
      tpu.enqueue_dma source(%arg0 : memref<2x1024xf32, #tpu.memory_space<any>>) target(%arg1 : memref<2x1024xf32, #tpu.memory_space<any>>) target_semaphore(%0 : memref<!tpu.dma_semaphore, #tpu.memory_space<semaphore_mem>>)
      tpu.wait_dma2 semaphore(%0 : memref<!tpu.dma_semaphore, #tpu.memory_space<semaphore_mem>>) src(%arg0 : memref<2x1024xf32, #tpu.memory_space<any>>) dst(%arg1 : memref<2x1024xf32, #tpu.memory_space<any>>)
      tpu.yield
    }) : () -> ()
    return
  }
}

</mosaic_0001>

<bundles_post_ra>
// kernel: tpu_custom_call.1
= control target key start
LH: loop header
LB: loop body
LE: loop exit
PB: predicated region body
PF: predicated region fallthrough
CT: control target
= control target key end

     0   :  { %s26_s12 = smov [#allocation2]   ;;  %s27_s13 = smov [#allocation3]   ;;  %s45_s0 = inlined_call_operand.hbm [shape: f32[2,1024], index: 0, kind: input, shape index: {}]   ;;  %s46_s1 = inlined_call_operand.hbm [shape: f32[2,1024], index: 1, kind: output, shape index: {}]  }
   0x1   :  { %s10_s8 = sshll.u32 %s45_s0, 4  ;;  %s12_s11 = sshll.u32 %s46_s1, 4  ;;  %s11_s8 = int_to_ptr.hbm [resolvable:$true] %s10_s8  ;;  %s13_s11 = int_to_ptr.hbm [resolvable:$true] %s12_s11 }
   0x2   :  { %s28_s14 = smov 0  }
   0x3   :  { %16 = dma.general %s11_s8, 256, %s13_s11, %s26_s12, %s27_s13, [#allocation4], %s28_s14, 0  }
   0x4   :  { %24 = dma.done.wait [#allocation2], 256 }
   0x5   :  { %25 = vsyncadd [#allocation2], 4294967040 }

</bundles_post_ra>
